<compile_context>
chip_gen: v7x
topology: tpu7x:2x2x1
jax: 0.10.0
libtpu: 0.0.40
codegen_flags: <defaults>
</compile_context>

<pallas_src>
import jax
import jax.numpy as jnp
from jax.experimental import pallas as pl
from jax.experimental.pallas import tpu as pltpu

_PACK = 16  # samples per packed 128-lane row (128 lanes / 8 input features)


def _sigmoid(x):
    # Exact sigmoid via tanh: 1 EUP op + 2 cheap VPU ops per element.
    return 0.5 * jnp.tanh(0.5 * x) + 0.5


def _mlp_kernel(x_ref, w1_ref, b1_ref, w2_ref, b2_ref, w3_ref, b3_ref, o_ref):
    x = x_ref[...]                                                     # (TILE_R, 128)

    # Layer 1: block-diagonal (128, 96) weight -> per-sample 8->6 linear, lane-dense.
    h1 = _sigmoid(jnp.dot(x, w1_ref[...],
                          preferred_element_type=jnp.float32) + b1_ref[...])   # (TILE_R, 96)

    # Layer 2: (96, 64) block-diagonal -> per-sample 6->4 linear.
    h2 = _sigmoid(jnp.dot(h1, w2_ref[...],
                          preferred_element_type=jnp.float32) + b2_ref[...])   # (TILE_R, 64)

    # Layer 3: (64, 16) block-diagonal -> per-sample 4->1 linear.
    h3 = jnp.dot(h2, w3_ref[...], preferred_element_type=jnp.float32) + b3_ref[...]
    o_ref[...] = _sigmoid(h3)                                          # (TILE_R, 16)


def _round_up(x: int, m: int) -> int:
    return ((x + m - 1) // m) * m


def mlp_forward(x, params, *, tile_r_max: int = 4096):
    """x: (..., 8) float32. Returns (..., 1) float32."""
    w1, b1, w2, b2, w3, b3 = params
    lead_shape = x.shape[:-1]
    n = 1
    for d in lead_shape:
        n *= d
    x2d = x.reshape(n, 8).astype(jnp.float32)

    # Pad samples only to a multiple of 128 (one 8-sublane packed-row group), never
    # to a multiple of the tile, so large inputs never pay an extra HBM copy pass.
    n_pad = _round_up(max(n, 1), 8 * _PACK)
    if n_pad != n:
        x2d = jnp.pad(x2d, ((0, n_pad - n), (0, 0)))
    r_total = n_pad // _PACK                        # packed rows, multiple of 8
    x_packed = x2d.reshape(r_total, 8 * _PACK)      # free contiguous view: (R, 128)

    f32 = jnp.float32
    eye = jnp.eye(_PACK, dtype=f32)
    # 16-way block-diagonal weights (sample s uses lanes [8s:8s+8] -> [6s:6s+6], etc.)
    w1_bd = jnp.kron(eye, jnp.asarray(w1, f32))     # (128, 96)
    w2_bd = jnp.kron(eye, jnp.asarray(w2, f32))     # (96, 64)
    w3_bd = jnp.kron(eye, jnp.asarray(w3, f32))     # (64, 16)
    b1_t = jnp.tile(jnp.asarray(b1, f32), _PACK).reshape(1, -1)   # (1, 96)
    b2_t = jnp.tile(jnp.asarray(b2, f32), _PACK).reshape(1, -1)   # (1, 64)
    b3_t = jnp.tile(jnp.asarray(b3, f32), _PACK).reshape(1, -1)   # (1, 16)

    tile_r = min(tile_r_max, r_total)               # multiple of 8 by construction
    grid = (pl.cdiv(r_total, tile_r),)              # ragged last block masked by Pallas

    def const(arr):  # tiny parameters stay VMEM-resident across all grid steps
        return pl.BlockSpec(arr.shape, lambda i: (0, 0))

    out = pl.pallas_call(
        _mlp_kernel,
        out_shape=jax.ShapeDtypeStruct((r_total, _PACK), f32),
        grid=grid,
        in_specs=[
            pl.BlockSpec((tile_r, 8 * _PACK), lambda i: (i, 0)),   # packed rows, tiled
            const(w1_bd), const(b1_t),
            const(w2_bd), const(b2_t),
            const(w3_bd), const(b3_t),
        ],
        out_specs=pl.BlockSpec((tile_r, _PACK), lambda i: (i, 0)),
        compiler_params=pltpu.CompilerParams(
            dimension_semantics=("parallel",),       # 2-TC sharding on v7x
            vmem_limit_bytes=32 * 1024 * 1024,
        ),
        cost_estimate=pl.CostEstimate(               # mem-bound hint for XLA scheduler
            flops=2 * r_total * (128 * 96 + 96 * 64 + 64 * 16),
            transcendentals=r_total * (96 + 64 + 16),
            bytes_accessed=r_total * (512 + 64)
            + 4 * (w1_bd.size + w2_bd.size + w3_bd.size
                   + b1_t.size + b2_t.size + b3_t.size),
        ),
    )(x_packed, w1_bd, b1_t, w2_bd, b2_t, w3_bd, b3_t)

    return out.reshape(-1)[:n].reshape(*lead_shape, 1)


def init_params(key):
    """Deterministic init matching nn.Linear shapes: W stored as (in, out) for x @ W."""
    ks = jax.random.split(key, 6)

    def lin(kw, kb, fan_in, fan_out):
        bound = 1.0 / (fan_in ** 0.5)
        w = jax.random.uniform(kw, (fan_in, fan_out), jnp.float32, -bound, bound)
        b = jax.random.uniform(kb, (fan_out,), jnp.float32, -bound, bound)
        return w, b

    w1, b1 = lin(ks[0], ks[1], 8, 6)
    w2, b2 = lin(ks[2], ks[3], 6, 4)
    w3, b3 = lin(ks[4], ks[5], 4, 1)
    return (w1, b1, w2, b2, w3, b3)


def _reference(x, params):
    w1, b1, w2, b2, w3, b3 = params
    h = jax.nn.sigmoid(x @ w1 + b1)
    h = jax.nn.sigmoid(h @ w2 + b2)
    return jax.nn.sigmoid(h @ w3 + b3)


if __name__ == "__main__":
    key = jax.random.PRNGKey(0)
    k_in, k_in2, k_p = jax.random.split(key, 3)

    params = init_params(k_p)
    fwd = jax.jit(mlp_forward)

    # Multi-dimensional input: leading batch dims (2, 4), feature dim 8.
    x = jax.random.normal(k_in, (2, 4, 8), dtype=jnp.float32)
    out = fwd(x, params)
    jax.block_until_ready(out)
    ref = _reference(x, params)
    assert out.shape == (2, 4, 1)
    assert jnp.allclose(out, ref, atol=1e-5, rtol=1e-5)

    # Unaligned sample count (exercises the pad-to-128-samples path).
    x2 = jax.random.normal(k_in2, (3, 5, 8), dtype=jnp.float32)
    out2 = fwd(x2, params)
    jax.block_until_ready(out2)
    ref2 = _reference(x2, params)
    assert out2.shape == (3, 5, 1)
    assert jnp.allclose(out2, ref2, atol=1e-5, rtol=1e-5)

    print("KERNEL_OK")
</pallas_src>

<mosaic_0001>
module attributes {stable_mosaic.version = 11 : i64} {
  func.func @_mlp_kernel(%arg0: i32, %arg1: memref<8x128xf32, #tpu.memory_space<vmem>>, %arg2: memref<128x96xf32, #tpu.memory_space<vmem>>, %arg3: memref<1x96xf32, #tpu.memory_space<vmem>>, %arg4: memref<96x64xf32, #tpu.memory_space<vmem>>, %arg5: memref<1x64xf32, #tpu.memory_space<vmem>>, %arg6: memref<64x16xf32, #tpu.memory_space<vmem>>, %arg7: memref<1x16xf32, #tpu.memory_space<vmem>>, %arg8: memref<8x16xf32, #tpu.memory_space<vmem>>) attributes {dimension_semantics = [#tpu.dimension_semantics<parallel>], iteration_bounds = array<i64: 1>, scalar_prefetch = 0 : i64, scratch_operands = 0 : i64, tpu.core_type = #tpu.core_type<tc>, window_params = [{transform_indices = @transform_0, window_bounds = array<i64: 8, 128>}, {pipeline_mode = #tpu.pipeline_mode<synchronous>, transform_indices = @transform_1, window_bounds = array<i64: 128, 96>}, {pipeline_mode = #tpu.pipeline_mode<synchronous>, transform_indices = @transform_2, window_bounds = array<i64: 1, 96>}, {pipeline_mode = #tpu.pipeline_mode<synchronous>, transform_indices = @transform_3, window_bounds = array<i64: 96, 64>}, {pipeline_mode = #tpu.pipeline_mode<synchronous>, transform_indices = @transform_4, window_bounds = array<i64: 1, 64>}, {pipeline_mode = #tpu.pipeline_mode<synchronous>, transform_indices = @transform_5, window_bounds = array<i64: 64, 16>}, {pipeline_mode = #tpu.pipeline_mode<synchronous>, transform_indices = @transform_6, window_bounds = array<i64: 1, 16>}, {transform_indices = @transform_7, window_bounds = array<i64: 8, 16>}]} {
    %c0 = arith.constant 0 : index
    %c0_0 = arith.constant 0 : index
    %0 = vector.load %arg1[%c0, %c0_0] : memref<8x128xf32, #tpu.memory_space<vmem>>, vector<8x128xf32>
    %c0_1 = arith.constant 0 : index
    %c0_2 = arith.constant 0 : index
    %1 = vector.load %arg2[%c0_1, %c0_2] : memref<128x96xf32, #tpu.memory_space<vmem>>, vector<128x96xf32>
    %cst = arith.constant dense<0.000000e+00> : vector<8x96xf32>
    %2 = tpu.matmul %0, %1, %cst {dimension_numbers = #tpu.dot_dimension_numbers<[1], [0], [0], [1], [0, 0, 1, 1], [], []>} : vector<8x128xf32>, vector<128x96xf32>, vector<8x96xf32> -> vector<8x96xf32>
    %c0_3 = arith.constant 0 : index
    %c0_4 = arith.constant 0 : index
    %3 = vector.load %arg3[%c0_3, %c0_4] : memref<1x96xf32, #tpu.memory_space<vmem>>, vector<1x96xf32>
    %4 = vector.broadcast %3 : vector<1x96xf32> to vector<8x96xf32>
    %5 = arith.addf %2, %4 : vector<8x96xf32>
    %cst_5 = arith.constant 5.000000e-01 : f32
    %6 = vector.broadcast %cst_5 : f32 to vector<8x96xf32>
    %7 = arith.mulf %6, %5 : vector<8x96xf32>
    %8 = math.tanh %7 : vector<8x96xf32>
    %cst_6 = arith.constant 5.000000e-01 : f32
    %9 = vector.broadcast %cst_6 : f32 to vector<8x96xf32>
    %10 = arith.mulf %9, %8 : vector<8x96xf32>
    %cst_7 = arith.constant 5.000000e-01 : f32
    %11 = vector.broadcast %cst_7 : f32 to vector<8x96xf32>
    %12 = arith.addf %10, %11 : vector<8x96xf32>
    %c0_8 = arith.constant 0 : index
    %c0_9 = arith.constant 0 : index
    %13 = vector.load %arg4[%c0_8, %c0_9] : memref<96x64xf32, #tpu.memory_space<vmem>>, vector<96x64xf32>
    %cst_10 = arith.constant dense<0.000000e+00> : vector<8x64xf32>
    %14 = tpu.matmul %12, %13, %cst_10 {dimension_numbers = #tpu.dot_dimension_numbers<[1], [0], [0], [1], [0, 0, 1, 1], [], []>} : vector<8x96xf32>, vector<96x64xf32>, vector<8x64xf32> -> vector<8x64xf32>
    %c0_11 = arith.constant 0 : index
    %c0_12 = arith.constant 0 : index
    %15 = vector.load %arg5[%c0_11, %c0_12] : memref<1x64xf32, #tpu.memory_space<vmem>>, vector<1x64xf32>
    %16 = vector.broadcast %15 : vector<1x64xf32> to vector<8x64xf32>
    %17 = arith.addf %14, %16 : vector<8x64xf32>
    %cst_13 = arith.constant 5.000000e-01 : f32
    %18 = vector.broadcast %cst_13 : f32 to vector<8x64xf32>
    %19 = arith.mulf %18, %17 : vector<8x64xf32>
    %20 = math.tanh %19 : vector<8x64xf32>
    %cst_14 = arith.constant 5.000000e-01 : f32
    %21 = vector.broadcast %cst_14 : f32 to vector<8x64xf32>
    %22 = arith.mulf %21, %20 : vector<8x64xf32>
    %cst_15 = arith.constant 5.000000e-01 : f32
    %23 = vector.broadcast %cst_15 : f32 to vector<8x64xf32>
    %24 = arith.addf %22, %23 : vector<8x64xf32>
    %c0_16 = arith.constant 0 : index
    %c0_17 = arith.constant 0 : index
    %25 = vector.load %arg6[%c0_16, %c0_17] : memref<64x16xf32, #tpu.memory_space<vmem>>, vector<64x16xf32>
    %cst_18 = arith.constant dense<0.000000e+00> : vector<8x16xf32>
    %26 = tpu.matmul %24, %25, %cst_18 {dimension_numbers = #tpu.dot_dimension_numbers<[1], [0], [0], [1], [0, 0, 1, 1], [], []>} : vector<8x64xf32>, vector<64x16xf32>, vector<8x16xf32> -> vector<8x16xf32>
    %c0_19 = arith.constant 0 : index
    %c0_20 = arith.constant 0 : index
    %27 = vector.load %arg7[%c0_19, %c0_20] : memref<1x16xf32, #tpu.memory_space<vmem>>, vector<1x16xf32>
    %28 = vector.broadcast %27 : vector<1x16xf32> to vector<8x16xf32>
    %29 = arith.addf %26, %28 : vector<8x16xf32>
    %cst_21 = arith.constant 5.000000e-01 : f32
    %30 = vector.broadcast %cst_21 : f32 to vector<8x16xf32>
    %31 = arith.mulf %30, %29 : vector<8x16xf32>
    %32 = math.tanh %31 : vector<8x16xf32>
    %cst_22 = arith.constant 5.000000e-01 : f32
    %33 = vector.broadcast %cst_22 : f32 to vector<8x16xf32>
    %34 = arith.mulf %33, %32 : vector<8x16xf32>
    %cst_23 = arith.constant 5.000000e-01 : f32
    %35 = vector.broadcast %cst_23 : f32 to vector<8x16xf32>
    %36 = arith.addf %34, %35 : vector<8x16xf32>
    %c0_24 = arith.constant 0 : index
    %c0_25 = arith.constant 0 : index
    %37 = vector.load %arg8[%c0_24, %c0_25] : memref<8x16xf32, #tpu.memory_space<vmem>>, vector<8x16xf32>
    tpu.vector_store %arg8[%c0_24, %c0_25], %36 {strides = array<i32>} : memref<8x16xf32, #tpu.memory_space<vmem>>, vector<8x16xf32>,
    return
  }
  func.func @transform_0(%arg0: i32) -> (i32, i32) {
    %c0_i32 = arith.constant 0 : i32
    %c0_i32_0 = arith.constant 0 : i32
    return %arg0, %c0_i32 : i32, i32
  }
  func.func @transform_1(%arg0: i32) -> (i32, i32) {
    %c0_i32 = arith.constant 0 : i32
    %c0_i32_0 = arith.constant 0 : i32
    %c0_i32_1 = arith.constant 0 : i32
    return %c0_i32, %c0_i32_0 : i32, i32
  }
  func.func @transform_2(%arg0: i32) -> (i32, i32) {
    %c0_i32 = arith.constant 0 : i32
    %c0_i32_0 = arith.constant 0 : i32
    %c0_i32_1 = arith.constant 0 : i32
    return %c0_i32, %c0_i32_0 : i32, i32
  }
  func.func @transform_3(%arg0: i32) -> (i32, i32) {
    %c0_i32 = arith.constant 0 : i32
    %c0_i32_0 = arith.constant 0 : i32
    %c0_i32_1 = arith.constant 0 : i32
    return %c0_i32, %c0_i32_0 : i32, i32
  }
  func.func @transform_4(%arg0: i32) -> (i32, i32) {
    %c0_i32 = arith.constant 0 : i32
    %c0_i32_0 = arith.constant 0 : i32
    %c0_i32_1 = arith.constant 0 : i32
    return %c0_i32, %c0_i32_0 : i32, i32
  }
  func.func @transform_5(%arg0: i32) -> (i32, i32) {
    %c0_i32 = arith.constant 0 : i32
    %c0_i32_0 = arith.constant 0 : i32
    %c0_i32_1 = arith.constant 0 : i32
    return %c0_i32, %c0_i32_0 : i32, i32
  }
  func.func @transform_6(%arg0: i32) -> (i32, i32) {
    %c0_i32 = arith.constant 0 : i32
    %c0_i32_0 = arith.constant 0 : i32
    %c0_i32_1 = arith.constant 0 : i32
    return %c0_i32, %c0_i32_0 : i32, i32
  }
  func.func @transform_7(%arg0: i32) -> (i32, i32) {
    %c0_i32 = arith.constant 0 : i32
    %c0_i32_0 = arith.constant 0 : i32
    return %arg0, %c0_i32 : i32, i32
  }
}

</mosaic_0001>

<bundles_post_ra>
// kernel: tile.18
= control target key start
LH: loop header
LB: loop body
LE: loop exit
PB: predicated region body
PF: predicated region fallthrough
CT: control target
= control target key end

     0   :  { %s28_s0 = inlined_call_operand.vmem [shape: f32[6], index: 0, kind: input, shape index: {}]   ;;  %s29_s1 = inlined_call_operand.vmem [shape: f32[16,6], index: 1, kind: output, shape index: {}]  }
   0x1   :  { %v4_v0 = vld [vmem:[%s28_s0] ss:$0 sm:$0xff] }
   0x2   :  { %5 = vst [vmem:[%s29_s1] sm:$0xff] %v4_v0  ;;  %8 = vst [vmem:[%s29_s1 + $0x8] sm:$0xff] %v4_v0 }

// kernel: tile.19
= control target key start
LH: loop header
LB: loop body
LE: loop exit
PB: predicated region body
PF: predicated region fallthrough
CT: control target
= control target key end

     0   :  { %s131_s10 = smov 90   ;;  %s132_s11 = smov 78   ;;  %vm3_vm0 = vcmask 48128   ;;  %vm9_vm1 = vcmask 786128   ;;  %vm15_vm2 = vcmask 736928   ;;  %vm21_vm3 = vcmask 687728   ;;  %s207_s0 = inlined_call_operand.vmem [shape: f32[16,6], index: 0, kind: input, shape index: {}]   ;;  %s208_s1 = inlined_call_operand.vmem [shape: f32[1,96], index: 1, kind: output, shape index: {}]  }
   0x1   :  { %v101_v0 = vld [vmem:[%s207_s0 + $0xf] sm:$0x1]   ;;  %v103_v1 = vld [vmem:[%s207_s0 + $0xd] sm:$0x1]   ;;  %v102_v2 = vld [vmem:[%s207_s0 + $0xe] sm:$0x1]  }
   0x2   :  { %7 = vrot.lane.b32.xlu0 %v101_v0, %s131_s10  ;;  %19 = vrot.lane.b32.xlu1 %v103_v1, %s132_s11  ;;  %v104_v3 = vld [vmem:[%s207_s0 + $0xc] sm:$0x1]   ;;  %s133_s16 = smov 84   ;;  %s134_s17 = smov 72   ;;  %v105_v4 = vld [vmem:[%s207_s0 + $0xb] sm:$0x1]  }
   0x3   :  { %v106_v5 = vld [vmem:[%s207_s0 + $0xa] sm:$0x1]   ;;  %v2_v6 = vld [vmem:[%s207_s0] sm:$0x1]   ;;  %s135_s24 = smov 66   ;;  %s136_s25 = smov 60  }
   0x4   :  { %4 = vst.msk [vmem:[#allocation0] sm:$0x1] %vm3_vm0, %v2_v6   ;;  %v107_v7 = vld [vmem:[%s207_s0 + $0x9] sm:$0x1]   ;;  %v108_v8 = vld [vmem:[%s207_s0 + $0x8] sm:$0x1]  }
   0x5   :  { %s137_s30 = smov 54   ;;  %s138_s2 = smov 48   ;;  %v109_v9 = vld [vmem:[%s207_s0 + $0x7] sm:$0x1]   ;;  %v110_v10 = vld [vmem:[%s207_s0 + $0x6] sm:$0x1]  }
   0x6   :  { %13 = vrot.lane.b32.xlu0 %v102_v2, %s133_s16  ;;  %25 = vrot.lane.b32.xlu1 %v104_v3, %s134_s17  ;;  %s139_s7 = smov 42   ;;  %s140_s8 = smov 36   ;;  %v111_v11 = vld [vmem:[%s207_s0 + $0x5] sm:$0x1]   ;;  %v112_v12 = vld [vmem:[%s207_s0 + $0x4] sm:$0x1]  }
   0x7   :  { %s141_s13 = smov 30   ;;  %s142_s14 = smov 24   ;;  %v113_v13 = vld [vmem:[%s207_s0 + $0x3] sm:$0x1]   ;;  %v114_v14 = vld [vmem:[%s207_s0 + $0x2] sm:$0x1]  }
   0x8   :  { %s143_s19 = smov 18   ;;  %s144_s20 = smov 12   ;;  %v115_v15 = vld [vmem:[%s207_s0 + $0x1] sm:$0x1]   ;;  %vm27_vm4 = vcmask 638528   ;;  %vm33_vm5 = vcmask 589328  }
   0x9   :  { %s145_s0 = smov 6   ;;  %vm39_vm6 = vcmask 540128   ;;  %vm45_vm7 = vcmask 490928   ;;  %vm51_vm8 = vcmask 441728   ;;  %vm57_vm9 = vcmask 392528  }
   0xa   :  { %31 = vrot.lane.b32.xlu0 %v105_v4, %s135_s24  ;;  %37 = vrot.lane.b32.xlu1 %v106_v5, %s136_s25  ;;  %vm63_vm10 = vcmask 343328   ;;  %vm69_vm11 = vcmask 294128   ;;  %vm75_vm12 = vcmask 244928   ;;  %vm81_vm13 = vcmask 195728  }
   0xb   :  { %vm87_vm14 = vcmask 146528   ;;  %vm93_vm15 = vcmask 97328  }
   0xe   :  { %43 = vrot.lane.b32.xlu0 %v107_v7, %s137_s30  ;;  %49 = vrot.lane.b32.xlu1 %v108_v8, %s138_s2 }
  0x12   :  { %55 = vrot.lane.b32.xlu0 %v109_v9, %s139_s7  ;;  %61 = vrot.lane.b32.xlu1 %v110_v10, %s140_s8 }
  0x16   :  { %67 = vrot.lane.b32.xlu0 %v111_v11, %s141_s13  ;;  %73 = vrot.lane.b32.xlu1 %v112_v12, %s142_s14 }
  0x1a   :  { %79 = vrot.lane.b32.xlu0 %v113_v13, %s143_s19  ;;  %85 = vrot.lane.b32.xlu1 %v114_v14, %s144_s20 }
  0x1e   :  { %91 = vrot.lane.b32.xlu0 %v115_v15, %s145_s0 }
  0x74   :  { %v8_v16 = vpop.permute.xlu0 %7   ;;  %v20_v17 = vpop.permute.xlu1 %19  }
  0x75   :  { %10 = vst.msk [vmem:[#allocation0] sm:$0x1] %vm9_vm1, %v8_v16  }
  0x78   :  { %v14_v18 = vpop.permute.xlu0 %13   ;;  %v26_v19 = vpop.permute.xlu1 %25  }
  0x79   :  { %16 = vst.msk [vmem:[#allocation0] sm:$0x1] %vm15_vm2, %v14_v18  }
  0x7a   :  { %22 = vst.msk [vmem:[#allocation0] sm:$0x1] %vm21_vm3, %v20_v17  }
  0x7b   :  { %28 = vst.msk [vmem:[#allocation0] sm:$0x1] %vm27_vm4, %v26_v19  }
  0x7c   :  { %v32_v20 = vpop.permute.xlu0 %31   ;;  %v38_v21 = vpop.permute.xlu1 %37  }
  0x7d   :  { %34 = vst.msk [vmem:[#allocation0] sm:$0x1] %vm33_vm5, %v32_v20  }
  0x7e   :  { %40 = vst.msk [vmem:[#allocation0] sm:$0x1] %vm39_vm6, %v38_v21  }
  0x80   :  { %v44_v22 = vpop.permute.xlu0 %43   ;;  %v50_v23 = vpop.permute.xlu1 %49  }
  0x81   :  { %46 = vst.msk [vmem:[#allocation0] sm:$0x1] %vm45_vm7, %v44_v22  }
  0x82   :  { %52 = vst.msk [vmem:[#allocation0] sm:$0x1] %vm51_vm8, %v50_v23  }
  0x84   :  { %v56_v24 = vpop.permute.xlu0 %55   ;;  %v62_v25 = vpop.permute.xlu1 %61  }
  0x85   :  { %58 = vst.msk [vmem:[#allocation0] sm:$0x1] %vm57_vm9, %v56_v24  }
  0x86   :  { %64 = vst.msk [vmem:[#allocation0] sm:$0x1] %vm63_vm10, %v62_v25  }
  0x88   :  { %v68_v26 = vpop.permute.xlu0 %67   ;;  %v74_v27 = vpop.permute.xlu1 %73  }
  0x89   :  { %70 = vst.msk [vmem:[#allocation0] sm:$0x1] %vm69_vm11, %v68_v26  }
  0x8a   :  { %76 = vst.msk [vmem:[#allocation0] sm:$0x1] %vm75_vm12, %v74_v27  }
  0x8c   :  { %v80_v28 = vpop.permute.xlu0 %79   ;;  %v86_v29 = vpop.permute.xlu1 %85  }
  0x8d   :  { %82 = vst.msk [vmem:[#allocation0] sm:$0x1] %vm81_vm13, %v80_v28  }
  0x8e   :  { %88 = vst.msk [vmem:[#allocation0] sm:$0x1] %vm87_vm14, %v86_v29  }
  0x90   :  { %v92_v30 = vpop.permute.xlu0 %91  }
  0x91   :  { %94 = vst.msk [vmem:[#allocation0] sm:$0x1] %vm93_vm15, %v92_v30  }
  0x98   :  { %v98_v31 = vld [vmem:[#allocation0] sm:$0x1] }
  0x99   :  { %100 = vst [vmem:[%s208_s1] sm:$0x1] %v98_v31 }

// kernel: tile.24
= control target key start
LH: loop header
LB: loop body
LE: loop exit
PB: predicated region body
PF: predicated region fallthrough
CT: control target
= control target key end

     0   :  { %s131_s10 = smov 60   ;;  %s132_s11 = smov 52   ;;  %vm3_vm0 = vcmask 31744   ;;  %vm9_vm1 = vcmask 523744   ;;  %vm15_vm2 = vcmask 490944   ;;  %vm21_vm3 = vcmask 458144   ;;  %s207_s0 = inlined_call_operand.vmem [shape: f32[16,4], index: 0, kind: input, shape index: {}]   ;;  %s208_s1 = inlined_call_operand.vmem [shape: f32[1,64], index: 1, kind: output, shape index: {}]  }
   0x1   :  { %v101_v0 = vld [vmem:[%s207_s0 + $0xf] sm:$0x1]   ;;  %v103_v1 = vld [vmem:[%s207_s0 + $0xd] sm:$0x1]   ;;  %v102_v2 = vld [vmem:[%s207_s0 + $0xe] sm:$0x1]  }
   0x2   :  { %7 = vrot.lane.b32.xlu0 %v101_v0, %s131_s10  ;;  %19 = vrot.lane.b32.xlu1 %v103_v1, %s132_s11  ;;  %v104_v3 = vld [vmem:[%s207_s0 + $0xc] sm:$0x1]   ;;  %s133_s16 = smov 56   ;;  %s134_s17 = smov 48   ;;  %v105_v4 = vld [vmem:[%s207_s0 + $0xb] sm:$0x1]  }
   0x3   :  { %v106_v5 = vld [vmem:[%s207_s0 + $0xa] sm:$0x1]   ;;  %v2_v6 = vld [vmem:[%s207_s0] sm:$0x1]   ;;  %s135_s24 = smov 44   ;;  %s136_s25 = smov 40  }
   0x4   :  { %4 = vst.msk [vmem:[#allocation0] sm:$0x1] %vm3_vm0, %v2_v6   ;;  %v107_v7 = vld [vmem:[%s207_s0 + $0x9] sm:$0x1]   ;;  %v108_v8 = vld [vmem:[%s207_s0 + $0x8] sm:$0x1]  }
   0x5   :  { %s137_s30 = smov 36   ;;  %s138_s2 = smov 32   ;;  %v109_v9 = vld [vmem:[%s207_s0 + $0x7] sm:$0x1]   ;;  %v110_v10 = vld [vmem:[%s207_s0 + $0x6] sm:$0x1]  }
   0x6   :  { %13 = vrot.lane.b32.xlu0 %v102_v2, %s133_s16  ;;  %25 = vrot.lane.b32.xlu1 %v104_v3, %s134_s17  ;;  %s139_s7 = smov 28   ;;  %s140_s8 = smov 24   ;;  %v111_v11 = vld [vmem:[%s207_s0 + $0x5] sm:$0x1]   ;;  %v112_v12 = vld [vmem:[%s207_s0 + $0x4] sm:$0x1]  }
   0x7   :  { %s141_s13 = smov 20   ;;  %s142_s14 = smov 16   ;;  %v113_v13 = vld [vmem:[%s207_s0 + $0x3] sm:$0x1]   ;;  %v114_v14 = vld [vmem:[%s207_s0 + $0x2] sm:$0x1]  }
   0x8   :  { %s143_s19 = smov 12   ;;  %s144_s20 = smov 8   ;;  %v115_v15 = vld [vmem:[%s207_s0 + $0x1] sm:$0x1]   ;;  %vm27_vm4 = vcmask 425344   ;;  %vm33_vm5 = vcmask 392544  }
   0x9   :  { %s145_s0 = smov 4   ;;  %vm39_vm6 = vcmask 359744   ;;  %vm45_vm7 = vcmask 326944   ;;  %vm51_vm8 = vcmask 294144   ;;  %vm57_vm9 = vcmask 261344  }
   0xa   :  { %31 = vrot.lane.b32.xlu0 %v105_v4, %s135_s24  ;;  %37 = vrot.lane.b32.xlu1 %v106_v5, %s136_s25  ;;  %vm63_vm10 = vcmask 228544   ;;  %vm69_vm11 = vcmask 195744   ;;  %vm75_vm12 = vcmask 162944   ;;  %vm81_vm13 = vcmask 130144  }
   0xb   :  { %vm87_vm14 = vcmask 97344   ;;  %vm93_vm15 = vcmask 64544  }
   0xe   :  { %43 = vrot.lane.b32.xlu0 %v107_v7, %s137_s30  ;;  %49 = vrot.lane.b32.xlu1 %v108_v8, %s138_s2 }
  0x12   :  { %55 = vrot.lane.b32.xlu0 %v109_v9, %s139_s7  ;;  %61 = vrot.lane.b32.xlu1 %v110_v10, %s140_s8 }
  0x16   :  { %67 = vrot.lane.b32.xlu0 %v111_v11, %s141_s13  ;;  %73 = vrot.lane.b32.xlu1 %v112_v12, %s142_s14 }
  0x1a   :  { %79 = vrot.lane.b32.xlu0 %v113_v13, %s143_s19  ;;  %85 = vrot.lane.b32.xlu1 %v114_v14, %s144_s20 }
  0x1e   :  { %91 = vrot.lane.b32.xlu0 %v115_v15, %s145_s0 }
  0x74   :  { %v8_v16 = vpop.permute.xlu0 %7   ;;  %v20_v17 = vpop.permute.xlu1 %19  }
  0x75   :  { %10 = vst.msk [vmem:[#allocation0] sm:$0x1] %vm9_vm1, %v8_v16  }
  0x78   :  { %v14_v18 = vpop.permute.xlu0 %13   ;;  %v26_v19 = vpop.permute.xlu1 %25  }
  0x79   :  { %16 = vst.msk [vmem:[#allocation0] sm:$0x1] %vm15_vm2, %v14_v18  }
  0x7a   :  { %22 = vst.msk [vmem:[#allocation0] sm:$0x1] %vm21_vm3, %v20_v17  }
  0x7b   :  { %28 = vst.msk [vmem:[#allocation0] sm:$0x1] %vm27_vm4, %v26_v19  }
  0x7c   :  { %v32_v20 = vpop.permute.xlu0 %31   ;;  %v38_v21 = vpop.permute.xlu1 %37  }
  0x7d   :  { %34 = vst.msk [vmem:[#allocation0] sm:$0x1] %vm33_vm5, %v32_v20  }
  0x7e   :  { %40 = vst.msk [vmem:[#allocation0] sm:$0x1] %vm39_vm6, %v38_v21  }
  0x80   :  { %v44_v22 = vpop.permute.xlu0 %43   ;;  %v50_v23 = vpop.permute.xlu1 %49  }
  0x81   :  { %46 = vst.msk [vmem:[#allocation0] sm:$0x1] %vm45_vm7, %v44_v22  }
  0x82   :  { %52 = vst.msk [vmem:[#allocation0] sm:$0x1] %vm51_vm8, %v50_v23  }
  0x84   :  { %v56_v24 = vpop.permute.xlu0 %55   ;;  %v62_v25 = vpop.permute.xlu1 %61  }
  0x85   :  { %58 = vst.msk [vmem:[#allocation0] sm:$0x1] %vm57_vm9, %v56_v24  }
  0x86   :  { %64 = vst.msk [vmem:[#allocation0] sm:$0x1] %vm63_vm10, %v62_v25  }
  0x88   :  { %v68_v26 = vpop.permute.xlu0 %67   ;;  %v74_v27 = vpop.permute.xlu1 %73  }
  0x89   :  { %70 = vst.msk [vmem:[#allocation0] sm:$0x1] %vm69_vm11, %v68_v26  }
  0x8a   :  { %76 = vst.msk [vmem:[#allocation0] sm:$0x1] %vm75_vm12, %v74_v27  }
  0x8c   :  { %v80_v28 = vpop.permute.xlu0 %79   ;;  %v86_v29 = vpop.permute.xlu1 %85  }
  0x8d   :  { %82 = vst.msk [vmem:[#allocation0] sm:$0x1] %vm81_vm13, %v80_v28  }
  0x8e   :  { %88 = vst.msk [vmem:[#allocation0] sm:$0x1] %vm87_vm14, %v86_v29  }
  0x90   :  { %v92_v30 = vpop.permute.xlu0 %91  }
  0x91   :  { %94 = vst.msk [vmem:[#allocation0] sm:$0x1] %vm93_vm15, %v92_v30  }
  0x98   :  { %v98_v31 = vld [vmem:[#allocation0] sm:$0x1] }
  0x99   :  { %100 = vst [vmem:[%s208_s1] sm:$0x1] %v98_v31 }

// kernel: mlp_forward.1
= control target key start
LH: loop header
LB: loop body
LE: loop exit
PB: predicated region body
PF: predicated region fallthrough
CT: control target
= control target key end

     0   :  { %v508_v0 = vmov 0.0|0.0   ;;  %vm509_vm0 = vmmov 0   ;;  %v510_v4 = vmov 0.0   ;;  %vm143_vm1 = vcmask 785408   ;;  %s698_s1 = inlined_call_operand.vmem [shape: f32[128,96], index: 1, kind: input, shape index: {}]   ;;  %s699_s3 = inlined_call_operand.vmem [shape: f32[96,64], index: 3, kind: input, shape index: {}]   ;;  %s700_s0 = inlined_call_operand.vmem [shape: f32[8,128], index: 0, kind: input, shape index: {}]   ;;  %s701_s2 = inlined_call_operand.vmem [shape: f32[1,96], index: 2, kind: input, shape index: {}]   ;;  %s702_s5 = inlined_call_operand.vmem [shape: f32[64,16], index: 5, kind: input, shape index: {}]   ;;  %s703_s4 = inlined_call_operand.vmem [shape: f32[1,64], index: 4, kind: input, shape index: {}]   ;;  %s704_s6 = inlined_call_operand.vmem [shape: f32[1,16], index: 6, kind: input, shape index: {}]   ;;  %s705_s7 = inlined_call_operand.vmem [shape: f32[8,16], index: 7, kind: output, shape index: {}]  }
   0x1   :  { %445 = vmatprep.subr.bf16.mxu0 %v508_v0  ;;  %v27_v1 = vld [vmem:[%s698_s1] sm:$0xff]  ;;  %v28_v2 = vld [vmem:[%s698_s1 + $0x8] sm:$0xff]  ;;  %v29_v3 = vld [vmem:[%s698_s1 + $0x10] sm:$0xff]  ;;  %396 = vmatprep.mubr.msk.f32.mxu0 %vm509_vm0, %v510_v4  ;;  %vm236_vm2 = vcmask 523264   ;;  %vm314_vm3 = vcmask 130048  }
   0x2   :  { %v446_v5 = vpack.c.bf16 %v28_v2, %v27_v1  ;;  %v30_v6 = vld [vmem:[%s698_s1 + $0x18] sm:$0xff]  ;;  %469 = vmatprep.subr.bf16.mxu1 %v508_v0  ;;  %423 = vmatprep.mubr.msk.f32.mxu1 %vm509_vm0, %v510_v4  ;;  %v31_v8 = vld [vmem:[%s698_s1 + $0x20] sm:$0xff]  ;;  %v32_v9 = vld [vmem:[%s698_s1 + $0x28] sm:$0xff] }
   0x3   :  { %v449_v7 = vpack.c.bf16 %v30_v6, %v29_v3  ;;  %v124_v10 = vld [vmem:[%s699_s3] sm:$0xff]  ;;  %v125_v11 = vld [vmem:[%s699_s3 + $0x8] sm:$0xff]  ;;  %v452_v12 = vpack.c.bf16 %v32_v9, %v31_v8  ;;  %v33_v14 = vld [vmem:[%s698_s1 + $0x30] sm:$0xff] }
   0x4   :  { %447 = vmatpush3.bf16.msra.mxu0 %v446_v5  ;;  %v470_v13 = vpack.c.bf16 %v125_v11, %v124_v10  ;;  %v34_v15 = vld [vmem:[%s698_s1 + $0x38] sm:$0xff]  ;;  %v35_v17 = vld [vmem:[%s698_s1 + $0x40] sm:$0xff]  ;;  %v36_v18 = vld [vmem:[%s698_s1 + $0x48] sm:$0xff] }
   0x5   :  { %448 = vmatprep.subr.bf16.mxu0 %v508_v0  ;;  %v455_v16 = vpack.c.bf16 %v34_v15, %v33_v14  ;;  %v458_v19 = vpack.c.bf16 %v36_v18, %v35_v17  ;;  %v37_v20 = vld [vmem:[%s698_s1 + $0x50] sm:$0xff]  ;;  %v38_v21 = vld [vmem:[%s698_s1 + $0x58] sm:$0xff]  ;;  %v39_v23 = vld [vmem:[%s698_s1 + $0x60] sm:$0xff] }
   0x6   :  { %471 = vmatpush3.bf16.msra.mxu1 %v470_v13  ;;  %v461_v22 = vpack.c.bf16 %v38_v21, %v37_v20  ;;  %v40_v24 = vld [vmem:[%s698_s1 + $0x68] sm:$0xff]  ;;  %v41_v26 = vld [vmem:[%s698_s1 + $0x70] sm:$0xff]  ;;  %v42_v27 = vld [vmem:[%s698_s1 + $0x78] sm:$0xff] }
   0x7   :  { %472 = vmatprep.subr.bf16.mxu1 %v508_v0  ;;  %v464_v25 = vpack.c.bf16 %v40_v24, %v39_v23  ;;  %v467_v28 = vpack.c.bf16 %v42_v27, %v41_v26  ;;  %v26_v29 = vld [vmem:[%s700_s0] sm:$0xff]  ;;  %v126_v30 = vld [vmem:[%s699_s3 + $0x10] sm:$0xff]  ;;  %v127_v31 = vld [vmem:[%s699_s3 + $0x18] sm:$0xff] }
   0x8   :  { %450 = vmatpush3.bf16.msra.mxu0 %v449_v7  ;;  %v473_v32 = vpack.c.bf16 %v127_v31, %v126_v30  ;;  %v128_v33 = vld [vmem:[%s699_s3 + $0x20] sm:$0xff]  ;;  %v129_v34 = vld [vmem:[%s699_s3 + $0x28] sm:$0xff]  ;;  %v130_v36 = vld [vmem:[%s699_s3 + $0x30] sm:$0xff] }
   0x9   :  { %451 = vmatprep.subr.bf16.mxu0 %v508_v0  ;;  %v476_v35 = vpack.c.bf16 %v129_v34, %v128_v33  ;;  %v131_v37 = vld [vmem:[%s699_s3 + $0x38] sm:$0xff]  ;;  %v132_v39 = vld [vmem:[%s699_s3 + $0x40] sm:$0xff]  ;;  %v133_v40 = vld [vmem:[%s699_s3 + $0x48] sm:$0xff] }
   0xa   :  { %474 = vmatpush3.bf16.msra.mxu1 %v473_v32  ;;  %v479_v38 = vpack.c.bf16 %v131_v37, %v130_v36  ;;  %v482_v41 = vpack.c.bf16 %v133_v40, %v132_v39  ;;  %v134_v42 = vld [vmem:[%s699_s3 + $0x50] sm:$0xff]  ;;  %v135_v43 = vld [vmem:[%s699_s3 + $0x58] sm:$0xff]  ;;  %v320_v45 = vld [vmem:[%s701_s2] ss:$0 sm:$0xff] }
   0xb   :  { %475 = vmatprep.subr.bf16.mxu1 %v508_v0  ;;  %v485_v44 = vpack.c.bf16 %v135_v43, %v134_v42  ;;  %v221_v53 = vld [vmem:[%s702_s5] sm:$0xff]  ;;  %v222_v54 = vld [vmem:[%s702_s5 + $0x8] sm:$0xff]  ;;  %v223_v56 = vld [vmem:[%s702_s5 + $0x10] sm:$0xff] }
   0xc   :  { %453 = vmatpush3.bf16.msra.mxu0 %v452_v12  ;;  %v488_v55 = vpack.c.bf16 %v222_v54, %v221_v53  ;;  %v224_v57 = vld [vmem:[%s702_s5 + $0x18] sm:$0xff]  ;;  %v225_v59 = vld [vmem:[%s702_s5 + $0x20] sm:$0xff]  ;;  %v226_v60 = vld [vmem:[%s702_s5 + $0x28] sm:$0xff] }
   0xd   :  { %454 = vmatprep.subr.bf16.mxu0 %v508_v0  ;;  %v491_v58 = vpack.c.bf16 %v224_v57, %v223_v56  ;;  %v494_v61 = vpack.c.bf16 %v226_v60, %v225_v59  ;;  %v227_v62 = vld [vmem:[%s702_s5 + $0x30] sm:$0xff]  ;;  %v228_v63 = vld [vmem:[%s702_s5 + $0x38] sm:$0xff]  ;;  %v321_v2 = vld [vmem:[%s703_s4] ss:$0 sm:$0xff] }
   0xe   :  { %477 = vmatpush3.bf16.msra.mxu1 %v476_v35  ;;  %v497_v1 = vpack.c.bf16 %v228_v63, %v227_v62  ;;  %v323_v9 = vld [vmem:[%s704_s6] ss:$0 sm:$0xff] }
   0xf   :  { %478 = vmatprep.subr.bf16.mxu1 %v508_v0 }
  0x10   :  { %456 = vmatpush3.bf16.msra.mxu0 %v455_v16 }
  0x11   :  { %457 = vmatprep.subr.bf16.mxu0 %v508_v0 }
  0x12   :  { %480 = vmatpush3.bf16.msra.mxu1 %v479_v38 }
  0x13   :  { %481 = vmatprep.subr.bf16.mxu1 %v508_v0 }
  0x14   :  { %459 = vmatpush3.bf16.msra.mxu0 %v458_v19 }
  0x15   :  { %460 = vmatprep.subr.bf16.mxu0 %v508_v0 }
  0x16   :  { %483 = vmatpush3.bf16.msra.mxu1 %v482_v41 }
  0x17   :  { %484 = vmatprep.subr.bf16.mxu1 %v508_v0 }
  0x18   :  { %462 = vmatpush3.bf16.msra.mxu0 %v461_v22 }
  0x19   :  { %463 = vmatprep.subr.bf16.mxu0 %v508_v0 }
  0x1a   :  { %486 = vmatpush3.bf16.msra.mxu1 %v485_v44 }
  0x1b   :  { %487 = vmatprep.subr.bf16.mxu1 %v508_v0 }
  0x1c   :  { %465 = vmatpush3.bf16.msra.mxu0 %v464_v25 }
  0x1d   :  { %466 = vmatprep.subr.bf16.mxu0 %v508_v0 }
  0x20   :  { %468 = vmatpush3.bf16.msra.mxu0 %v467_v28 }
  0x23   :  { %397 = vmatmul.mubr.f32.vlgmr.msra.gmra.mrb[0].mxu0 %v26_v29 }
  0xf6   :  { %v116_v46 = vpop.f32.mrb[0].mxu0 }
  0xf7   :  { %v117_v47 = vadd.f32 %v320_v45, %v116_v46  ;;  %v398_v48 = vpop.f32.mrb[1].mxu0 }
  0xf9   :  { %v120_v49 = vmul.f32 0.5, %v117_v47 }
  0xfb   :  { %502 = vtanh.f32 %v120_v49 }
 0x105   :  { %v503_v50 = vpop.eup %502 }
 0x106   :  { %v122_v51 = vmul.f32 0.5, %v503_v50 }
 0x108   :  { %v123_v52 = vadd.f32 0.5, %v122_v51 }
 0x10a   :  { %424 = vmatmul.mubr.msk.f32.vlgmr.msra.gmra.mrb[0].mxu1 %vm143_vm1, %v123_v52 }
 0x10b   :  { %442 = vmatprep.mubr.msk.f32.mxu1 %vm509_vm0, %v510_v4  ;;  %489 = vmatpush3.bf16.msra.mxu1 %v488_v55 }
 0x10c   :  { %490 = vmatprep.subr.bf16.mxu1 %v508_v0 }
 0x10f   :  { %492 = vmatpush3.bf16.msra.mxu1 %v491_v58 }
 0x110   :  { %493 = vmatprep.subr.bf16.mxu1 %v508_v0 }
 0x113   :  { %495 = vmatpush3.bf16.msra.mxu1 %v494_v61 }
 0x114   :  { %496 = vmatprep.subr.bf16.mxu1 %v508_v0 }
 0x117   :  { %498 = vmatpush3.bf16.msra.mxu1 %v497_v1 }
 0x1dd   :  { %v213_v3 = vpop.f32.mrb[0].mxu1 }
 0x1de   :  { %v214_v4 = vadd.f32 %v321_v2, %v213_v3  ;;  %v425_v5 = vpop.f32.mrb[1].mxu1 }
 0x1e0   :  { %v217_v6 = vmul.f32 0.5, %v214_v4 }
 0x1e2   :  { %504 = vtanh.f32 %v217_v6 }
 0x1ec   :  { %v505_v0 = vpop.eup %504 }
 0x1ed   :  { %v219_v7 = vmul.f32 0.5, %v505_v0 }
 0x1ef   :  { %v220_v8 = vadd.f32 0.5, %v219_v7 }
 0x1f1   :  { %443 = vmatmul.mubr.msk.f32.vlgmr.msra.gmra.mrb[2].mxu1 %vm236_vm2, %v220_v8 }
 0x2c4   :  { %v306_v10 = vpop.f32.mrb[2].mxu1 }
 0x2c5   :  { %v307_v11 = vadd.f32 %v323_v9, %v306_v10  ;;  %v444_v12 = vpop.f32.mrb[3].mxu1 }
 0x2c7   :  { %v310_v13 = vmul.f32 0.5, %v307_v11 }
 0x2c9   :  { %506 = vtanh.f32 %v310_v13 }
 0x2d3   :  { %v507_v14 = vpop.eup %506 }
 0x2d4   :  { %v312_v15 = vmul.f32 0.5, %v507_v14 }
 0x2d6   :  { %v313_v16 = vadd.f32 0.5, %v312_v15 }
 0x2d8   :  { %315 = vst.msk [vmem:[%s705_s7] sm:$0xff] %vm314_vm3, %v313_v16 }

</bundles_post_ra>
